<compile_context>
chip_gen: v6e
topology: v6e:2x2x1
jax: 0.10.0
libtpu: 0.0.40
codegen_flags: <defaults>
</compile_context>

<pallas_src>
import functools

import jax
import jax.numpy as jnp
from jax.experimental import pallas as pl
from jax.experimental.pallas import tpu as pltpu


def _mlp_kernel(nsub, xt_ref,
                w1_ref, b1_ref, w2_ref, b2_ref,
                w3_ref, b3_ref, w4_ref, b4_ref,
                o_ref):
    """Fused (Linear+ReLU) x3 + Linear on one batch tile, f32 accumulation.

    The tile is split into `nsub` sub-chunks (static Python unroll, static
    slices) so the MXU work of one sub-chunk can overlap the VPU epilogue
    (bias + ReLU + bf16 cast) of another.
    """
    sub = xt_ref.shape[0] // nsub
    for j in range(nsub):                                  # static unroll
        rows = pl.ds(j * sub, sub)
        # Layer 1: t is already folded into the padded xt block / W1 rows.
        h = jnp.dot(xt_ref[rows, :], w1_ref[...],
                    preferred_element_type=jnp.float32)
        h = jnp.maximum((h + b1_ref[...]).astype(jnp.bfloat16), 0.0)
        # Layers 2 / 3 (cast-then-ReLU: bf16 VPU epilogue, identical math).
        h = jnp.dot(h, w2_ref[...], preferred_element_type=jnp.float32)
        h = jnp.maximum((h + b2_ref[...]).astype(jnp.bfloat16), 0.0)
        h = jnp.dot(h, w3_ref[...], preferred_element_type=jnp.float32)
        h = jnp.maximum((h + b3_ref[...]).astype(jnp.bfloat16), 0.0)
        # Output layer: 128-column padded -> full (unmasked) lane-dense store.
        out = jnp.dot(h, w4_ref[...], preferred_element_type=jnp.float32)
        out = out + b4_ref[...]
        o_ref[rows, :] = out.astype(o_ref.dtype)


def _round_up(v, m):
    return m * ((v + m - 1) // m)


def _choose_batch_tile(batch, *, max_tile=2048, align=16):
    """Adaptive tile: aim for exactly 2 grid steps (v7x has 2 TensorCores on
    the 'parallel' axis), capped at `max_tile` with an even step count for
    large batches. Always a multiple of 16 (sublane / bf16-packing safe)."""
    tile = _round_up(pl.cdiv(batch, 2), align)
    if tile > max_tile:
        steps = pl.cdiv(batch, max_tile)
        steps += steps % 2                         # keep an even step count
        tile = _round_up(pl.cdiv(batch, steps), align)
    return max(tile, 8)


def mlpd_forward(x, t, kparams, *, batch_tile=None, max_tile=2048):
    """x: (B, D) f32, t: (B, 1) f32. Returns (B, D) f32."""
    B, D = x.shape
    d_in_pad = kparams["d_in_pad"]
    d_out = kparams["d_out"]
    d_out_pad = kparams["b4"].shape[1]

    if batch_tile is None:
        batch_tile = _choose_batch_tile(B, max_tile=max_tile)
    assert batch_tile % 8 == 0, "batch tile must be a multiple of 8 (sublanes)"

    Bp = batch_tile * pl.cdiv(B, batch_tile)

    # Fold t into the x block: one lane-padded bf16 "concat" input
    #   cols [0, D) -> x,  col D -> t,  cols [D+1, d_in_pad) -> zeros
    # (the matching rows of W1 are zero-padded, so the math is unchanged).
    xt = jnp.concatenate([x, t], axis=-1).astype(jnp.bfloat16)
    xt = jnp.pad(xt, ((0, Bp - B), (0, d_in_pad - (D + 1))))

    weight_order = ("w1", "b1", "w2", "b2", "w3", "b3", "w4", "b4")
    weights = [kparams[k] for k in weight_order]

    def resident_spec(a):
        # Whole-array block, constant index map -> fetched once, stays
        # VMEM-resident across grid steps (no per-step re-fetch needed).
        return pl.BlockSpec(a.shape, lambda i: (0,) * a.ndim)

    # 2-way in-kernel sub-chunking whenever the tile splits cleanly.
    nsub = 2 if batch_tile % 16 == 0 else 1

    grid = (Bp // batch_tile,)
    in_specs = [pl.BlockSpec((batch_tile, d_in_pad), lambda i: (i, 0))]
    in_specs += [resident_spec(w) for w in weights]
    out_spec = pl.BlockSpec((batch_tile, d_out_pad), lambda i: (i, 0))

    out = pl.pallas_call(
        functools.partial(_mlp_kernel, nsub),
        out_shape=jax.ShapeDtypeStruct((Bp, d_out_pad), jnp.bfloat16),
        grid_spec=pl.GridSpec(grid=grid, in_specs=in_specs, out_specs=out_spec),
        compiler_params=pltpu.CompilerParams(
            dimension_semantics=("parallel",),       # shard batch tiles over TCs
            vmem_limit_bytes=32 * 1024 * 1024),      # keeps v5e safe at big tiles
    )(xt, *weights)

    return out[:B, :d_out].astype(jnp.float32)


def init_mlpd_params(key, input_dim, hidden_layers=(256, 256, 256)):
    """PyTorch-style nn.Linear init (uniform +/- 1/sqrt(fan_in)); weights stored
    as (in, out) so the kernel computes h @ W + b."""
    dims_in = [input_dim + 1] + list(hidden_layers)
    dims_out = list(hidden_layers) + [input_dim]
    params = []
    for din, dout in zip(dims_in, dims_out):
        key, kw, kb = jax.random.split(key, 3)
        bound = 1.0 / jnp.sqrt(jnp.float32(din))
        w = jax.random.uniform(kw, (din, dout), jnp.float32, -bound, bound)
        b = jax.random.uniform(kb, (1, dout), jnp.float32, -bound, bound)
        params.append((w, b))
    return params


def prepare_kernel_params(params, input_dim):
    """Cast weights to bf16 (MXU-native), zero-pad W1's input dim to 16 (so the
    folded [x|t] block is a single dense bf16 input) and the output layer to a
    multiple of 128 columns so stores are lane-dense."""
    (w1, b1), (w2, b2), (w3, b3), (w4, b4) = params
    d_in = input_dim + 1
    d_in_pad = 16 * pl.cdiv(d_in, 16)
    d_out = w4.shape[1]
    d_out_pad = 128 * pl.cdiv(d_out, 128)
    bf16 = jnp.bfloat16
    return dict(
        w1=jnp.pad(w1, ((0, d_in_pad - d_in), (0, 0))).astype(bf16),
        b1=b1.astype(jnp.float32),
        w2=w2.astype(bf16), b2=b2.astype(jnp.float32),
        w3=w3.astype(bf16), b3=b3.astype(jnp.float32),
        w4=jnp.pad(w4, ((0, 0), (0, d_out_pad - d_out))).astype(bf16),
        b4=jnp.pad(b4, ((0, 0), (0, d_out_pad - d_out))).astype(jnp.float32),
        d_in_pad=d_in_pad, d_out=d_out,
    )


def mlpd_reference_matched(x, t, kp):
    """Pure-JAX reference using the exact same bf16/f32 mixed precision
    (cast-then-ReLU epilogue, bf16 output) as the kernel."""
    d_in_pad = kp["d_in_pad"]
    xt = jnp.concatenate([x, t], axis=-1).astype(jnp.bfloat16)
    xt = jnp.pad(xt, ((0, 0), (0, d_in_pad - xt.shape[1])))
    h = jnp.dot(xt, kp["w1"], preferred_element_type=jnp.float32)
    h = jnp.maximum((h + kp["b1"]).astype(jnp.bfloat16), 0.0)
    for w, b in ((kp["w2"], kp["b2"]), (kp["w3"], kp["b3"])):
        h = jnp.dot(h, w, preferred_element_type=jnp.float32)
        h = jnp.maximum((h + b).astype(jnp.bfloat16), 0.0)
    out = jnp.dot(h, kp["w4"], preferred_element_type=jnp.float32) + kp["b4"]
    out = out.astype(jnp.bfloat16)
    return out[:, :kp["d_out"]].astype(jnp.float32)


def mlpd_reference_f32(x, t, params):
    """Full-f32 reference mirroring the PyTorch forward (concat + Linears)."""
    h = jnp.concatenate([x, t], axis=-1)
    for w, b in params[:-1]:
        h = jnp.maximum(h @ w + b, 0.0)
    w, b = params[-1]
    return h @ w + b


if __name__ == "__main__":
    key = jax.random.PRNGKey(0)
    k_params, k_x = jax.random.split(key)

    input_dim = 8
    hidden_layers = (256, 256, 256)   # module default
    batch = 64                        # small example; tile=32 -> 2 grid steps

    params = init_mlpd_params(k_params, input_dim, hidden_layers)
    kparams = prepare_kernel_params(params, input_dim)

    x = jax.random.normal(k_x, (batch, input_dim), jnp.float32)
    t = jnp.ones((batch, 1), jnp.float32)     # as in MLPd.sample()

    out = mlpd_forward(x, t, kparams)
    out = jax.block_until_ready(out)
    assert out.shape == (batch, input_dim)

    # Tight check against a reference with identical bf16/f32 arithmetic.
    ref = mlpd_reference_matched(x, t, kparams)
    assert jnp.allclose(out, ref, atol=1e-2, rtol=1e-2), \
        "mismatch vs matched-precision reference"

    # Loose semantic check against the original f32 concat+Linear forward.
    ref32 = mlpd_reference_f32(x, t, params)
    assert jnp.allclose(out, ref32, atol=1e-1, rtol=1e-1), \
        "mismatch vs f32 reference"

    print("KERNEL_OK")
</pallas_src>

<mosaic_0001>
module attributes {stable_mosaic.version = 11 : i64} {
  func.func @_mlp_kernel(%arg0: i32, %arg1: memref<32x16xbf16, #tpu.memory_space<vmem>>, %arg2: memref<16x256xbf16, #tpu.memory_space<vmem>>, %arg3: memref<1x256xf32, #tpu.memory_space<vmem>>, %arg4: memref<256x256xbf16, #tpu.memory_space<vmem>>, %arg5: memref<1x256xf32, #tpu.memory_space<vmem>>, %arg6: memref<256x256xbf16, #tpu.memory_space<vmem>>, %arg7: memref<1x256xf32, #tpu.memory_space<vmem>>, %arg8: memref<256x128xbf16, #tpu.memory_space<vmem>>, %arg9: memref<1x128xf32, #tpu.memory_space<vmem>>, %arg10: memref<32x128xbf16, #tpu.memory_space<vmem>>) attributes {dimension_semantics = [#tpu.dimension_semantics<parallel>], iteration_bounds = array<i64: 2>, scalar_prefetch = 0 : i64, scratch_operands = 0 : i64, tpu.core_type = #tpu.core_type<tc>, window_params = [{transform_indices = @transform_0, window_bounds = array<i64: 32, 16>}, {pipeline_mode = #tpu.pipeline_mode<synchronous>, transform_indices = @transform_1, window_bounds = array<i64: 16, 256>}, {pipeline_mode = #tpu.pipeline_mode<synchronous>, transform_indices = @transform_2, window_bounds = array<i64: 1, 256>}, {pipeline_mode = #tpu.pipeline_mode<synchronous>, transform_indices = @transform_3, window_bounds = array<i64: 256, 256>}, {pipeline_mode = #tpu.pipeline_mode<synchronous>, transform_indices = @transform_4, window_bounds = array<i64: 1, 256>}, {pipeline_mode = #tpu.pipeline_mode<synchronous>, transform_indices = @transform_5, window_bounds = array<i64: 256, 256>}, {pipeline_mode = #tpu.pipeline_mode<synchronous>, transform_indices = @transform_6, window_bounds = array<i64: 1, 256>}, {pipeline_mode = #tpu.pipeline_mode<synchronous>, transform_indices = @transform_7, window_bounds = array<i64: 256, 128>}, {pipeline_mode = #tpu.pipeline_mode<synchronous>, transform_indices = @transform_8, window_bounds = array<i64: 1, 128>}, {transform_indices = @transform_9, window_bounds = array<i64: 32, 128>}]} {
    %c0 = arith.constant 0 : index
    %c0_0 = arith.constant 0 : index
    %0 = vector.load %arg1[%c0, %c0_0] : memref<32x16xbf16, #tpu.memory_space<vmem>>, vector<16x16xbf16>
    %c0_1 = arith.constant 0 : index
    %c0_2 = arith.constant 0 : index
    %1 = vector.load %arg2[%c0_1, %c0_2] : memref<16x256xbf16, #tpu.memory_space<vmem>>, vector<16x256xbf16>
    %cst = arith.constant dense<0.000000e+00> : vector<16x256xf32>
    %2 = tpu.matmul %0, %1, %cst {dimension_numbers = #tpu.dot_dimension_numbers<[1], [0], [0], [1], [0, 0, 1, 1], [], []>} : vector<16x16xbf16>, vector<16x256xbf16>, vector<16x256xf32> -> vector<16x256xf32>
    %c0_3 = arith.constant 0 : index
    %c0_4 = arith.constant 0 : index
    %3 = vector.load %arg3[%c0_3, %c0_4] : memref<1x256xf32, #tpu.memory_space<vmem>>, vector<1x256xf32>
    %4 = vector.broadcast %3 : vector<1x256xf32> to vector<16x256xf32>
    %5 = arith.addf %2, %4 : vector<16x256xf32>
    %6 = arith.truncf %5 : vector<16x256xf32> to vector<16x256xbf16>
    %cst_5 = arith.constant 0.000000e+00 : bf16
    %7 = vector.broadcast %cst_5 : bf16 to vector<16x256xbf16>
    %8 = arith.maximumf %6, %7 : vector<16x256xbf16>
    %c0_6 = arith.constant 0 : index
    %c0_7 = arith.constant 0 : index
    %9 = vector.load %arg4[%c0_6, %c0_7] : memref<256x256xbf16, #tpu.memory_space<vmem>>, vector<256x256xbf16>
    %cst_8 = arith.constant dense<0.000000e+00> : vector<16x256xf32>
    %10 = tpu.matmul %8, %9, %cst_8 {dimension_numbers = #tpu.dot_dimension_numbers<[1], [0], [0], [1], [0, 0, 1, 1], [], []>} : vector<16x256xbf16>, vector<256x256xbf16>, vector<16x256xf32> -> vector<16x256xf32>
    %c0_9 = arith.constant 0 : index
    %c0_10 = arith.constant 0 : index
    %11 = vector.load %arg5[%c0_9, %c0_10] : memref<1x256xf32, #tpu.memory_space<vmem>>, vector<1x256xf32>
    %12 = vector.broadcast %11 : vector<1x256xf32> to vector<16x256xf32>
    %13 = arith.addf %10, %12 : vector<16x256xf32>
    %14 = arith.truncf %13 : vector<16x256xf32> to vector<16x256xbf16>
    %cst_11 = arith.constant 0.000000e+00 : bf16
    %15 = vector.broadcast %cst_11 : bf16 to vector<16x256xbf16>
    %16 = arith.maximumf %14, %15 : vector<16x256xbf16>
    %c0_12 = arith.constant 0 : index
    %c0_13 = arith.constant 0 : index
    %17 = vector.load %arg6[%c0_12, %c0_13] : memref<256x256xbf16, #tpu.memory_space<vmem>>, vector<256x256xbf16>
    %cst_14 = arith.constant dense<0.000000e+00> : vector<16x256xf32>
    %18 = tpu.matmul %16, %17, %cst_14 {dimension_numbers = #tpu.dot_dimension_numbers<[1], [0], [0], [1], [0, 0, 1, 1], [], []>} : vector<16x256xbf16>, vector<256x256xbf16>, vector<16x256xf32> -> vector<16x256xf32>
    %c0_15 = arith.constant 0 : index
    %c0_16 = arith.constant 0 : index
    %19 = vector.load %arg7[%c0_15, %c0_16] : memref<1x256xf32, #tpu.memory_space<vmem>>, vector<1x256xf32>
    %20 = vector.broadcast %19 : vector<1x256xf32> to vector<16x256xf32>
    %21 = arith.addf %18, %20 : vector<16x256xf32>
    %22 = arith.truncf %21 : vector<16x256xf32> to vector<16x256xbf16>
    %cst_17 = arith.constant 0.000000e+00 : bf16
    %23 = vector.broadcast %cst_17 : bf16 to vector<16x256xbf16>
    %24 = arith.maximumf %22, %23 : vector<16x256xbf16>
    %c0_18 = arith.constant 0 : index
    %c0_19 = arith.constant 0 : index
    %25 = vector.load %arg8[%c0_18, %c0_19] : memref<256x128xbf16, #tpu.memory_space<vmem>>, vector<256x128xbf16>
    %cst_20 = arith.constant dense<0.000000e+00> : vector<16x128xf32>
    %26 = tpu.matmul %24, %25, %cst_20 {dimension_numbers = #tpu.dot_dimension_numbers<[1], [0], [0], [1], [0, 0, 1, 1], [], []>} : vector<16x256xbf16>, vector<256x128xbf16>, vector<16x128xf32> -> vector<16x128xf32>
    %c0_21 = arith.constant 0 : index
    %c0_22 = arith.constant 0 : index
    %27 = vector.load %arg9[%c0_21, %c0_22] : memref<1x128xf32, #tpu.memory_space<vmem>>, vector<1x128xf32>
    %28 = vector.broadcast %27 : vector<1x128xf32> to vector<16x128xf32>
    %29 = arith.addf %26, %28 : vector<16x128xf32>
    %30 = arith.truncf %29 : vector<16x128xf32> to vector<16x128xbf16>
    %c0_23 = arith.constant 0 : index
    %c0_24 = arith.constant 0 : index
    %31 = vector.load %arg10[%c0_23, %c0_24] : memref<32x128xbf16, #tpu.memory_space<vmem>>, vector<16x128xbf16>
    tpu.vector_store %arg10[%c0_23, %c0_24], %30 {strides = array<i32>} : memref<32x128xbf16, #tpu.memory_space<vmem>>, vector<16x128xbf16>,
    %c16 = arith.constant 16 : index
    %c0_25 = arith.constant 0 : index
    %32 = vector.load %arg1[%c16, %c0_25] : memref<32x16xbf16, #tpu.memory_space<vmem>>, vector<16x16xbf16>
    %c0_26 = arith.constant 0 : index
    %c0_27 = arith.constant 0 : index
    %33 = vector.load %arg2[%c0_26, %c0_27] : memref<16x256xbf16, #tpu.memory_space<vmem>>, vector<16x256xbf16>
    %cst_28 = arith.constant dense<0.000000e+00> : vector<16x256xf32>
    %34 = tpu.matmul %32, %33, %cst_28 {dimension_numbers = #tpu.dot_dimension_numbers<[1], [0], [0], [1], [0, 0, 1, 1], [], []>} : vector<16x16xbf16>, vector<16x256xbf16>, vector<16x256xf32> -> vector<16x256xf32>
    %c0_29 = arith.constant 0 : index
    %c0_30 = arith.constant 0 : index
    %35 = vector.load %arg3[%c0_29, %c0_30] : memref<1x256xf32, #tpu.memory_space<vmem>>, vector<1x256xf32>
    %36 = vector.broadcast %35 : vector<1x256xf32> to vector<16x256xf32>
    %37 = arith.addf %34, %36 : vector<16x256xf32>
    %38 = arith.truncf %37 : vector<16x256xf32> to vector<16x256xbf16>
    %cst_31 = arith.constant 0.000000e+00 : bf16
    %39 = vector.broadcast %cst_31 : bf16 to vector<16x256xbf16>
    %40 = arith.maximumf %38, %39 : vector<16x256xbf16>
    %c0_32 = arith.constant 0 : index
    %c0_33 = arith.constant 0 : index
    %41 = vector.load %arg4[%c0_32, %c0_33] : memref<256x256xbf16, #tpu.memory_space<vmem>>, vector<256x256xbf16>
    %cst_34 = arith.constant dense<0.000000e+00> : vector<16x256xf32>
    %42 = tpu.matmul %40, %41, %cst_34 {dimension_numbers = #tpu.dot_dimension_numbers<[1], [0], [0], [1], [0, 0, 1, 1], [], []>} : vector<16x256xbf16>, vector<256x256xbf16>, vector<16x256xf32> -> vector<16x256xf32>
    %c0_35 = arith.constant 0 : index
    %c0_36 = arith.constant 0 : index
    %43 = vector.load %arg5[%c0_35, %c0_36] : memref<1x256xf32, #tpu.memory_space<vmem>>, vector<1x256xf32>
    %44 = vector.broadcast %43 : vector<1x256xf32> to vector<16x256xf32>
    %45 = arith.addf %42, %44 : vector<16x256xf32>
    %46 = arith.truncf %45 : vector<16x256xf32> to vector<16x256xbf16>
    %cst_37 = arith.constant 0.000000e+00 : bf16
    %47 = vector.broadcast %cst_37 : bf16 to vector<16x256xbf16>
    %48 = arith.maximumf %46, %47 : vector<16x256xbf16>
    %c0_38 = arith.constant 0 : index
    %c0_39 = arith.constant 0 : index
    %49 = vector.load %arg6[%c0_38, %c0_39] : memref<256x256xbf16, #tpu.memory_space<vmem>>, vector<256x256xbf16>
    %cst_40 = arith.constant dense<0.000000e+00> : vector<16x256xf32>
    %50 = tpu.matmul %48, %49, %cst_40 {dimension_numbers = #tpu.dot_dimension_numbers<[1], [0], [0], [1], [0, 0, 1, 1], [], []>} : vector<16x256xbf16>, vector<256x256xbf16>, vector<16x256xf32> -> vector<16x256xf32>
    %c0_41 = arith.constant 0 : index
    %c0_42 = arith.constant 0 : index
    %51 = vector.load %arg7[%c0_41, %c0_42] : memref<1x256xf32, #tpu.memory_space<vmem>>, vector<1x256xf32>
    %52 = vector.broadcast %51 : vector<1x256xf32> to vector<16x256xf32>
    %53 = arith.addf %50, %52 : vector<16x256xf32>
    %54 = arith.truncf %53 : vector<16x256xf32> to vector<16x256xbf16>
    %cst_43 = arith.constant 0.000000e+00 : bf16
    %55 = vector.broadcast %cst_43 : bf16 to vector<16x256xbf16>
    %56 = arith.maximumf %54, %55 : vector<16x256xbf16>
    %c0_44 = arith.constant 0 : index
    %c0_45 = arith.constant 0 : index
    %57 = vector.load %arg8[%c0_44, %c0_45] : memref<256x128xbf16, #tpu.memory_space<vmem>>, vector<256x128xbf16>
    %cst_46 = arith.constant dense<0.000000e+00> : vector<16x128xf32>
    %58 = tpu.matmul %56, %57, %cst_46 {dimension_numbers = #tpu.dot_dimension_numbers<[1], [0], [0], [1], [0, 0, 1, 1], [], []>} : vector<16x256xbf16>, vector<256x128xbf16>, vector<16x128xf32> -> vector<16x128xf32>
    %c0_47 = arith.constant 0 : index
    %c0_48 = arith.constant 0 : index
    %59 = vector.load %arg9[%c0_47, %c0_48] : memref<1x128xf32, #tpu.memory_space<vmem>>, vector<1x128xf32>
    %60 = vector.broadcast %59 : vector<1x128xf32> to vector<16x128xf32>
    %61 = arith.addf %58, %60 : vector<16x128xf32>
    %62 = arith.truncf %61 : vector<16x128xf32> to vector<16x128xbf16>
    %c16_49 = arith.constant 16 : index
    %c0_50 = arith.constant 0 : index
    %63 = vector.load %arg10[%c16_49, %c0_50] : memref<32x128xbf16, #tpu.memory_space<vmem>>, vector<16x128xbf16>
    tpu.vector_store %arg10[%c16_49, %c0_50], %62 {strides = array<i32>} : memref<32x128xbf16, #tpu.memory_space<vmem>>, vector<16x128xbf16>,
    return
  }
  func.func @transform_0(%arg0: i32) -> (i32, i32) {
    %c0_i32 = arith.constant 0 : i32
    %c0_i32_0 = arith.constant 0 : i32
    return %arg0, %c0_i32 : i32, i32
  }
  func.func @transform_1(%arg0: i32) -> (i32, i32) {
    %c0_i32 = arith.constant 0 : i32
    %c0_i32_0 = arith.constant 0 : i32
    %c0_i32_1 = arith.constant 0 : i32
    return %c0_i32, %c0_i32_0 : i32, i32
  }
  func.func @transform_2(%arg0: i32) -> (i32, i32) {
    %c0_i32 = arith.constant 0 : i32
    %c0_i32_0 = arith.constant 0 : i32
    %c0_i32_1 = arith.constant 0 : i32
    return %c0_i32, %c0_i32_0 : i32, i32
  }
  func.func @transform_3(%arg0: i32) -> (i32, i32) {
    %c0_i32 = arith.constant 0 : i32
    %c0_i32_0 = arith.constant 0 : i32
    %c0_i32_1 = arith.constant 0 : i32
    return %c0_i32, %c0_i32_0 : i32, i32
  }
  func.func @transform_4(%arg0: i32) -> (i32, i32) {
    %c0_i32 = arith.constant 0 : i32
    %c0_i32_0 = arith.constant 0 : i32
    %c0_i32_1 = arith.constant 0 : i32
    return %c0_i32, %c0_i32_0 : i32, i32
  }
  func.func @transform_5(%arg0: i32) -> (i32, i32) {
    %c0_i32 = arith.constant 0 : i32
    %c0_i32_0 = arith.constant 0 : i32
    %c0_i32_1 = arith.constant 0 : i32
    return %c0_i32, %c0_i32_0 : i32, i32
  }
  func.func @transform_6(%arg0: i32) -> (i32, i32) {
    %c0_i32 = arith.constant 0 : i32
    %c0_i32_0 = arith.constant 0 : i32
    %c0_i32_1 = arith.constant 0 : i32
    return %c0_i32, %c0_i32_0 : i32, i32
  }
  func.func @transform_7(%arg0: i32) -> (i32, i32) {
    %c0_i32 = arith.constant 0 : i32
    %c0_i32_0 = arith.constant 0 : i32
    %c0_i32_1 = arith.constant 0 : i32
    return %c0_i32, %c0_i32_0 : i32, i32
  }
  func.func @transform_8(%arg0: i32) -> (i32, i32) {
    %c0_i32 = arith.constant 0 : i32
    %c0_i32_0 = arith.constant 0 : i32
    %c0_i32_1 = arith.constant 0 : i32
    return %c0_i32, %c0_i32_0 : i32, i32
  }
  func.func @transform_9(%arg0: i32) -> (i32, i32) {
    %c0_i32 = arith.constant 0 : i32
    %c0_i32_0 = arith.constant 0 : i32
    return %arg0, %c0_i32 : i32, i32
  }
}

</mosaic_0001>

<bundles_post_ra>
// kernel: tpu_custom_call.1
= control target key start
LH: loop header
LB: loop body
LE: loop exit
PB: predicated region body
PF: predicated region fallthrough
CT: control target
= control target key end

     0   :  { %14 = vsyncpa [#allocation3], 0  ;;  %s3188_s0 = inlined_call_operand.vmem [shape: bf16[64,16], index: 0, kind: input, shape index: {}]   ;;  %s3189_s1 = inlined_call_operand.vmem [shape: bf16[16,256], index: 1, kind: input, shape index: {}]   ;;  %s3190_s2 = inlined_call_operand.vmem [shape: f32[1,256], index: 2, kind: input, shape index: {}]   ;;  %s3191_s3 = inlined_call_operand.hbm [shape: bf16[256,256], index: 3, kind: input, shape index: {}]   ;;  %s3192_s4 = inlined_call_operand.vmem [shape: f32[1,256], index: 4, kind: input, shape index: {}]   ;;  %s3193_s5 = inlined_call_operand.hbm [shape: bf16[256,256], index: 5, kind: input, shape index: {}]   ;;  %s3194_s6 = inlined_call_operand.vmem [shape: f32[1,256], index: 6, kind: input, shape index: {}]   ;;  %s3195_s7 = inlined_call_operand.hbm [shape: bf16[256,128], index: 7, kind: input, shape index: {}]   ;;  %s3196_s8 = inlined_call_operand.vmem [shape: f32[1,128], index: 8, kind: input, shape index: {}]   ;;  %s3197_s9 = inlined_call_operand.hbm [shape: bf16[64,128], index: 9, kind: output, shape index: {}]  }
   0x1   :  { %15 = vsyncpa [#allocation6], 0 }
   0x2   :  { %16 = vsyncpa [#allocation4], 0 }
   0x3   :  { %18 = vsyncpa [#allocation4 + $0x1], 0  ;;  %s2696_s30 = smov 0   ;;  %s2698_s10 = smov 0  }
   0x4   :  { %s2700_s11 = smov 0   ;;  %s2702_s12 = smov 0  }
   0x5 LB: > { %s2717_s13 = sadd.s32 4294967295, %s2633_s12   ;;  %s2025_s14 = sadd.s32 4294967294, %s2633_s12   ;;  %s2633_s12 = sphi %s2702_s12, %s3273_s12   ;;  %s2629_s11 = sphi %s2700_s11, %s3272_s11   ;;  %s2625_s10 = sphi %s2698_s10, %s3271_s10   ;;  %s2621_s30 = sphi %s2696_s30, %s3270_s30  }
   0x6   : > { %s2721_s15 = sadd.s32 1, %s2633_s12   ;;  %s225_s16 = sadd.s32 1, %s2629_s11 }
   0x7   : > { %s222_s17 = ssub.s32 %s2633_s12, %s2721_s15  ;;  %p235_p0 = scmp.ne.s32.totalorder %s2629_s11, %s2625_s10 }
   0x8   : > { %p223_p1 = scmp.eq.s32.totalorder %s222_s17, 0  ;;  %p236_p2 = scmp.eq.s32.totalorder %s2717_s13, 1 }
   0x9   : > { %p241_p3 = scmp.ne.s32.totalorder %s2625_s10, %s2621_s30  ;;  %p242_p4 = scmp.eq.s32.totalorder %s2025_s14, 1 }
   0xa   : > { %s2732_s18 = scalar_select %p223_p1, %s2629_s11, %s225_s16  }
   0xb   : > { %p2734_p5 = por %p236_p2, %p235_p0  ;;  %p2738_p6 = por %p242_p4, %p241_p3 }
   0xc   : > { %p2026_p7 = scmp.ge.s32.totalorder %s2633_s12, 1  ;;  %p249_p8 = scmp.lt.s32.totalorder %s2633_s12, 3 }
   0xd   : > { %s3221_s19 = scalar_select %p2734_p5, 1, 0 }
   0xe   : > { %s3222_s20 = scalar_select %p2738_p6, 1, 0 }
   0xf   : > { %p3198_p9 = scmp.eq.s32.totalorder %s2717_s13, 0  ;;  %p2745_p10 = pnand %p2026_p7, %p249_p8 }
  0x10   : > { %s2635_s22 = smov [#allocation5]   ;;  %s2636_s25 = smov [#allocation2]  }
  0x11   : > { %p2291_p11 = pneg %p2745_p10  ;;  %s283_s23 = sshll.u32 %s2635_s22, 4  ;;  %s284_s23 = int_to_ptr.vmem [resolvable:$true] %s283_s23 }
  0x12   : > { %s267_s26 = sshll.u32 %s2636_s25, 4  ;;  %s2637_s27 = smov [#allocation7]   ;;  %s268_s26 = int_to_ptr.vmem [resolvable:$true] %s267_s26 }
  0x13   : > { %p2753_p12 = pnand %p3198_p9, %p2291_p11  ;;  %s299_s28 = sshll.u32 %s2637_s27, 4  ;;  %s300_s28 = int_to_ptr.vmem [resolvable:$true] %s299_s28 }
  0x14   : > { %s2498_s29 = scalar_lea.vmem %s284_s23, 4096  ;;  %p2506_p3 = scmp.lt.s32.totalorder %s284_s23, %s284_s23 }
  0x15   : > { %p2489_p13 = pneg %p2753_p12  ;;  %p2499_p0 = scmp.ne.s32.totalorder %s284_s23, %s2498_s29 }
  0x16   : > { %p2507_p4 = scmp.lt.s32.totalorder %s2498_s29, %s2498_s29 }
  0x17   : > { %p2501_p1 = pnand %p2499_p0, %p2489_p13 }
  0x18   : > { %p2508_p7 = por %p2507_p4, %p2506_p3 }
  0x19   : > { %p2502_p2 = pneg %p2501_p1 }
  0x1b   : > { %p2509_p8 = pnand %p2508_p7, %p2502_p2 }
  0x1d   : > { %2512 = shalt.err (!%p2509_p8)
}
  0x1e   : > { %s2638_s14 = smov 128   ;;  %s2639_s16 = smov 8  }
  0x1f   : > { %2297 = dma.hbm_to_vmem [thread:$0]  (!%p2753_p12), %s3193_s5, 4096, %s284_s23, [#allocation6], %s2638_s14, %s2638_s14, %s2639_s16  }
  0x20   : > { %s2524_s25 = scalar_lea.vmem %s268_s26, 4096  ;;  %p2532_p9 = scmp.lt.s32.totalorder %s268_s26, %s268_s26 }
  0x21   : > { %p2525_p11 = scmp.ne.s32.totalorder %s268_s26, %s2524_s25  ;;  %p2533_p6 = scmp.lt.s32.totalorder %s2524_s25, %s2524_s25 }
  0x23   : > { %p2527_p0 = pnand %p2525_p11, %p2489_p13  ;;  %p2534_p3 = por %p2533_p6, %p2532_p9 }
  0x25   : > { %p2528_p1 = pneg %p2527_p0 }
  0x27   : > { %p2535_p2 = pnand %p2534_p3, %p2528_p1 }
  0x29   : > { %2538 = shalt.err (!%p2535_p2)
}
  0x2a   : > { %2294 = dma.hbm_to_vmem [thread:$0]  (!%p2753_p12), %s3191_s3, 4096, %s268_s26, [#allocation3], %s2638_s14, %s2638_s14, %s2639_s16  }
  0x2b   : > { %s2550_s23 = scalar_lea.vmem %s300_s28, 2048  ;;  %p2558_p11 = scmp.lt.s32.totalorder %s300_s28, %s300_s28 }
  0x2c   : > { %p2551_p4 = scmp.ne.s32.totalorder %s300_s28, %s2550_s23  ;;  %p2559_p0 = scmp.lt.s32.totalorder %s2550_s23, %s2550_s23 }
  0x2e   : > { %p2553_p7 = pnand %p2551_p4, %p2489_p13  ;;  %p2560_p5 = por %p2559_p0, %p2558_p11 }
  0x30   : > { %p2554_p8 = pneg %p2553_p7 }
  0x32   : > { %p2561_p6 = pnand %p2560_p5, %p2554_p8 }
  0x34   : > { %2564 = shalt.err (!%p2561_p6)
}
  0x35   : > { %s2640_s17 = smov 64   ;;  %s2641_s22 = smov 4  }
  0x36   : > { %2300 = dma.hbm_to_vmem [thread:$0]  (!%p2753_p12), %s3195_s7, 2048, %s300_s28, [#allocation6], %s2640_s17, %s2640_s17, %s2641_s22  }
  0x37   : > { %327 = sbr.rel (%p2745_p10) target bundleno = 1330 (0x532), region = 56 }
  0x3c   : > { %p3225_p9 = scmp.eq.s32.totalorder %s2717_s13, 0 }
  0x3e   : > { %2608 = dma.done.wait (%p3225_p9), [#allocation3], 4096   ;;  %p3226_p13 = pmov %p3225_p9 }
  0x3f   : > { %p3227_p5 = pmov %p3225_p9 }
  0x40   : > { %2610 = vsyncadd (%p3226_p13), [#allocation3], 4294963200 }
  0x41   : > { %2612 = dma.done.wait (%p3227_p5), [#allocation6], 6144   ;;  %p3228_p1 = pmov %p3227_p5 }
  0x42   : > { %s2036_s24 = sshll.u32 %s2717_s13, 2  ;;  %v3200_v0 = vmov 0   ;;  %v2803_v1 = vld [vmem:[%s3189_s1 + $0x4] ss:$8 sps:$4 sm:$0xff]   ;;  %v2808_v2 = vld [vmem:[%s3189_s1] ss:$8 sps:$4 sm:$0xff]   ;;  %v385_v62 = vlaneseq }
  0x43   : > { %2614 = vsyncadd (%p3228_p1), [#allocation6], 4294961152  ;;  %446 = vmatprep.mubr.bf16.mxu1 %v3200_v0  ;;  %p372_p12 = scmp.lt.s32.totalorder %s2036_s24, 7  ;;  %428 = vmatprep.subr.bf16.mxu1 %v2803_v1  ;;  %vm410_vm0 = vcmask 130048   ;;  %v2813_v4 = vld [vmem:[#allocation2 + $0x70] ss:$8 sps:$4 sm:$0xff]  }
  0x44   : > { %429 = vmatpush1.bf16.msra.mxu1 %v2808_v2  ;;  %v2815_v5 = vld [vmem:[#allocation2 + $0x74] ss:$8 sps:$4 sm:$0xff]   ;;  %v2817_v6 = vld [vmem:[#allocation2 + $0x64] ss:$8 sps:$4 sm:$0xff]   ;;  %v2822_v7 = vld [vmem:[#allocation2 + $0x60] ss:$8 sps:$4 sm:$0xff]  }
  0x45   : > { %s3275_s24 = smov (!%p372_p12, %s2036_s24), 7  ;;  %665 = vmatprep.subr.bf16.mxu1 %v2815_v5  ;;  %v2825_v8 = vld [vmem:[#allocation2 + $0x54] ss:$8 sps:$4 sm:$0xff]   ;;  %v2828_v9 = vld [vmem:[#allocation2 + $0x50] ss:$8 sps:$4 sm:$0xff]   ;;  %v386_v63 = vshrl.u32 %v385_v62, 7 }
  0x46   : > { %s2037_s21 = sshll.u32 %s3275_s24, 2  ;;  %v2831_v10 = vld [vmem:[#allocation2 + $0x44] ss:$8 sps:$4 sm:$0xff]   ;;  %v2834_v11 = vld [vmem:[#allocation2 + $0x40] ss:$8 sps:$4 sm:$0xff]   ;;  %s368_s16 = sand.u32 1, %s2625_s10  }
  0x47   : > { %s2798_s14 = scalar_lea.vmem %s3188_s0, %s2037_s21  ;;  %v2837_v12 = vld [vmem:[#allocation2 + $0x34] ss:$8 sps:$4 sm:$0xff]   ;;  %v2840_v13 = vld [vmem:[#allocation2 + $0x30] ss:$8 sps:$4 sm:$0xff]   ;;  %v2842_v14 = vld [vmem:[#allocation2 + $0x24] ss:$8 sps:$4 sm:$0xff]  }
  0x48   : > { %v2357_v3 = vld [vmem:[%s2798_s14] sm:$0xff]   ;;  %v2847_v16 = vld [vmem:[#allocation2 + $0x14] ss:$8 sps:$4 sm:$0xff]   ;;  %v2851_v17 = vld [vmem:[#allocation2 + $0x10] ss:$8 sps:$4 sm:$0xff]   ;;  %s2035_s17 = sshll.u32 %s368_s16, 4 }
  0x49   : > { %2041 = vmatmul.mubr.msk.bf16.vlgmr.msra.gmra.mxu1 %vm410_vm0, %v2357_v3  ;;  %v2845_v15 = vld [vmem:[#allocation2 + $0x20] ss:$8 sps:$4 sm:$0xff]   ;;  %v2853_v18 = vld [vmem:[#allocation2 + $0x4] ss:$8 sps:$4 sm:$0xff]   ;;  %v2859_v20 = vld [vmem:[#allocation2 + $0xf4] ss:$8 sps:$4 sm:$0xff]  }
  0x4a   : > { %666 = vmatpush1.bf16.msra.mxu1 %v2813_v4  ;;  %v2857_v19 = vld [vmem:[#allocation2] ss:$8 sps:$4 sm:$0xff]   ;;  %v2863_v21 = vld [vmem:[#allocation2 + $0xf0] ss:$8 sps:$4 sm:$0xff]   ;;  %v2865_v22 = vld [vmem:[#allocation2 + $0xe4] ss:$8 sps:$4 sm:$0xff]  }
  0x4b   : > { %667 = vmatprep.subr.bf16.mxu1 %v2817_v6  ;;  %v2869_v23 = vld [vmem:[#allocation2 + $0xe0] ss:$8 sps:$4 sm:$0xff]   ;;  %v2871_v24 = vld [vmem:[#allocation2 + $0xd4] ss:$8 sps:$4 sm:$0xff]   ;;  %v2875_v25 = vld [vmem:[#allocation2 + $0xd0] ss:$8 sps:$4 sm:$0xff]  }
  0x4c   : > { %v2877_v26 = vld [vmem:[#allocation2 + $0xc4] ss:$8 sps:$4 sm:$0xff]   ;;  %v2881_v27 = vld [vmem:[#allocation2 + $0xc0] ss:$8 sps:$4 sm:$0xff]   ;;  %v2883_v28 = vld [vmem:[#allocation2 + $0xb4] ss:$8 sps:$4 sm:$0xff]  }
  0x4d   : > { %v2887_v29 = vld [vmem:[#allocation2 + $0xb0] ss:$8 sps:$4 sm:$0xff]   ;;  %v2892_v30 = vld [vmem:[#allocation2 + $0xa4] ss:$8 sps:$4 sm:$0xff]   ;;  %v2894_v31 = vld [vmem:[#allocation2 + $0xa0] ss:$8 sps:$4 sm:$0xff]  }
  0x4e   : > { %668 = vmatpush1.bf16.msra.mxu1 %v2822_v7  ;;  %v2898_v32 = vld [vmem:[#allocation2 + $0x94] ss:$8 sps:$4 sm:$0xff]   ;;  %v2900_v33 = vld [vmem:[#allocation2 + $0x90] ss:$8 sps:$4 sm:$0xff]   ;;  %v2904_v34 = vld [vmem:[#allocation2 + $0x84] ss:$8 sps:$4 sm:$0xff]  }
  0x4f   : > { %669 = vmatprep.subr.bf16.mxu1 %v2825_v8  ;;  %v2906_v35 = vld [vmem:[#allocation2 + $0x80] ss:$8 sps:$4 sm:$0xff]   ;;  %v2910_v36 = vld [vmem:[#allocation5 + $0x74] ss:$8 sps:$4 sm:$0xff]   ;;  %v2912_v37 = vld [vmem:[#allocation5 + $0x70] ss:$8 sps:$4 sm:$0xff]  }
  0x50   : > { %v2914_v38 = vld [vmem:[#allocation5 + $0x64] ss:$8 sps:$4 sm:$0xff]   ;;  %916 = vmatprep.subr.bf16.mxu0 %v2910_v36  ;;  %v2918_v39 = vld [vmem:[#allocation5 + $0x60] ss:$8 sps:$4 sm:$0xff]   ;;  %v2921_v40 = vld [vmem:[#allocation5 + $0x54] ss:$8 sps:$4 sm:$0xff]  }
  0x51   : > { %917 = vmatpush1.bf16.msra.mxu0 %v2912_v37  ;;  %v2924_v41 = vld [vmem:[#allocation5 + $0x50] ss:$8 sps:$4 sm:$0xff]   ;;  %v2927_v42 = vld [vmem:[#allocation5 + $0x44] ss:$8 sps:$4 sm:$0xff]   ;;  %v2930_v43 = vld [vmem:[#allocation5 + $0x40] ss:$8 sps:$4 sm:$0xff]  }
  0x52   : > { %670 = vmatpush1.bf16.msra.mxu1 %v2828_v9  ;;  %918 = vmatprep.subr.bf16.mxu0 %v2914_v38  ;;  %v2933_v44 = vld [vmem:[#allocation5 + $0x34] ss:$8 sps:$4 sm:$0xff]   ;;  %v2936_v45 = vld [vmem:[#allocation5 + $0x30] ss:$8 sps:$4 sm:$0xff]   ;;  %v2939_v46 = vld [vmem:[#allocation5 + $0x24] ss:$8 sps:$4 sm:$0xff]  }
  0x53   : > { %671 = vmatprep.subr.bf16.mxu1 %v2831_v10  ;;  %3229 = vst [vmem:[#allocation12_spill] sm:$0xff] %v2939_v46  ;;  %v2942_v47 = vld [vmem:[#allocation5 + $0x20] ss:$8 sps:$4 sm:$0xff]   ;;  %v2945_v48 = vld [vmem:[#allocation5 + $0x14] ss:$8 sps:$4 sm:$0xff]   ;;  %v2988_v3 = vsub.s32 0, %v386_v63 }
  0x54   : > { %3230 = vst [vmem:[#allocation13_spill] sm:$0xff] %v2942_v47  ;;  %3231 = vst [vmem:[#allocation14_spill] sm:$0xff] %v2945_v48  ;;  %v2948_v49 = vld [vmem:[#allocation5 + $0x10] ss:$8 sps:$4 sm:$0xff]   ;;  %v2951_v50 = vld [vmem:[#allocation5 + $0x4] ss:$8 sps:$4 sm:$0xff]  }
  0x55   : > { %919 = vmatpush1.bf16.msra.mxu0 %v2918_v39  ;;  %3232 = vst [vmem:[#allocation15_spill] sm:$0xff] %v2948_v49  ;;  %3233 = vst [vmem:[#allocation16_spill] sm:$0xff] %v2951_v50  ;;  %v2954_v51 = vld [vmem:[#allocation5] ss:$8 sps:$4 sm:$0xff]   ;;  %v2957_v52 = vld [vmem:[#allocation5 + $0xf4] ss:$8 sps:$4 sm:$0xff]  }
  0x56   : > { %672 = vmatpush1.bf16.msra.mxu1 %v2834_v11  ;;  %920 = vmatprep.subr.bf16.mxu0 %v2921_v40  ;;  %3234 = vst [vmem:[#allocation17_spill] sm:$0xff] %v2954_v51  ;;  %3235 = vst [vmem:[#allocation18_spill] sm:$0xff] %v2957_v52  ;;  %v2960_v53 = vld [vmem:[#allocation5 + $0xf0] ss:$8 sps:$4 sm:$0xff]   ;;  %v2963_v54 = vld [vmem:[#allocation5 + $0xe4] ss:$8 sps:$4 sm:$0xff]  }
  0x57   : > { %673 = vmatprep.subr.bf16.mxu1 %v2837_v12  ;;  %3236 = vst [vmem:[#allocation19_spill] sm:$0xff] %v2960_v53  ;;  %3237 = vst [vmem:[#allocation20_spill] sm:$0xff] %v2963_v54  ;;  %v2966_v55 = vld [vmem:[#allocation5 + $0xe0] ss:$8 sps:$4 sm:$0xff]   ;;  %v2969_v56 = vld [vmem:[#allocation5 + $0xd4] ss:$8 sps:$4 sm:$0xff]  }
  0x58   : > { %3238 = vst [vmem:[#allocation21_spill] sm:$0xff] %v2966_v55  ;;  %3239 = vst [vmem:[#allocation22_spill] sm:$0xff] %v2969_v56  ;;  %v2972_v57 = vld [vmem:[#allocation5 + $0xd0] ss:$8 sps:$4 sm:$0xff]   ;;  %v2975_v58 = vld [vmem:[#allocation5 + $0xc4] ss:$8 sps:$4 sm:$0xff]  }
  0x59   : > { %921 = vmatpush1.bf16.msra.mxu0 %v2924_v41  ;;  %3240 = vst [vmem:[#allocation23_spill] sm:$0xff] %v2972_v57  ;;  %3241 = vst [vmem:[#allocation24_spill] sm:$0xff] %v2975_v58  ;;  %v2978_v59 = vld [vmem:[#allocation5 + $0xc0] ss:$8 sps:$4 sm:$0xff]   ;;  %v2981_v60 = vld [vmem:[#allocation5 + $0xb4] ss:$8 sps:$4 sm:$0xff]  }
  0x5a   : > { %674 = vmatpush1.bf16.msra.mxu1 %v2840_v13  ;;  %922 = vmatprep.subr.bf16.mxu0 %v2927_v42  ;;  %3242 = vst [vmem:[#allocation25_spill] sm:$0xff] %v2978_v59  ;;  %3243 = vst [vmem:[#allocation26_spill] sm:$0xff] %v2981_v60  ;;  %v2984_v61 = vld [vmem:[#allocation5 + $0xb0] ss:$8 sps:$4 sm:$0xff]   ;;  %v383_v0 = vld [vmem:[%s3190_s2] sm:$0x3] }
  0x5b   : > { %675 = vmatprep.subr.bf16.mxu1 %v2842_v14  ;;  %3244 = vst [vmem:[#allocation27_spill] sm:$0xff] %v2984_v61  ;;  %s3122_s27 = scalar_lea.vmem [#allocation8], %s2035_s17  ;;  %s2221_s28 = sshll.u32 %s2717_s13, 8 }
  0x5c   : > { %s1932_s26 = sshll.u32 %s3122_s27, 4  ;;  %s3143_s23 = scalar_lea.hbm %s3197_s9, %s2221_s28  ;;  %s3138_s26 = int_to_ptr.vmem [resolvable:$true] %s1932_s26 }
  0x5d   : > { %923 = vmatpush1.bf16.msra.mxu0 %v2930_v43  ;;  %s3148_s17 = scalar_lea.sflag [#allocation4], %s368_s16  ;;  %s2565_s13 = scalar_lea.vmem %s3138_s26, 256 }
  0x5e   : > { %676 = vmatpush1.bf16.msra.mxu1 %v2845_v15  ;;  %924 = vmatprep.subr.bf16.mxu0 %v2933_v44  ;;  %p2566_p10 = scmp.ne.s32.totalorder %s3138_s26, %s2565_s13  ;;  %p3268_p3 = scmp.ne.s32.totalorder %s3221_s19, 0 }
  0x5f   : > { %677 = vmatprep.subr.bf16.mxu1 %v2847_v16  ;;  %s2643_s22 = smov [#allocation8]  }
  0x60   : > { %p2567_p2 = pnand %p2566_p10, %p3268_p3  ;;  %s2569_s25 = sshll.u32 %s2643_s22, 4  ;;  %s2570_s25 = int_to_ptr.vmem [resolvable:$false] %s2569_s25 }
  0x61   : > { %925 = vmatpush1.bf16.msra.mxu0 %v2936_v45  ;;  %s2571_s24 = scalar_lea.vmem %s2570_s25, 512  ;;  %p2572_p7 = scmp.lt.s32.totalorder %s3138_s26, %s2570_s25 }
  0x62   : > { %678 = vmatpush1.bf16.msra.mxu1 %v2851_v17  ;;  %926 = vmatprep.subr.bf16.mxu0 %v2939_v46  ;;  %v3001_v46 = vld [vmem:[#allocation5 + $0xa0] ss:$8 sps:$4 sm:$0xff]   ;;  %p2568_p4 = pneg %p2567_p2  ;;  %p2573_p8 = scmp.lt.s32.totalorder %s2571_s24, %s2565_s13 }
  0x63   : > { %679 = vmatprep.subr.bf16.mxu1 %v2853_v18 }
  0x64   : > { %p2574_p11 = por %p2573_p8, %p2572_p7 }
  0x65   : > { %927 = vmatpush1.bf16.msra.mxu0 %v2942_v47 }
  0x66   : > { %680 = vmatpush1.bf16.msra.mxu1 %v2857_v19  ;;  %928 = vmatprep.subr.bf16.mxu0 %v2945_v48  ;;  %p2575_p0 = pnand %p2574_p11, %p2568_p4 }
  0x67   : > { %681 = vmatprep.subr.bf16.mxu1 %v2859_v20 }
  0x69   : > { %929 = vmatpush1.bf16.msra.mxu0 %v2948_v49  ;;  %v3245_v49 = vmov 0  }
  0x6a   : > { %682 = vmatpush2.bf16.msra.mxu1 %v2863_v21  ;;  %930 = vmatprep.subr.bf16.mxu0 %v2951_v50 }
  0x6b   : > { %683 = vmatprep.subr.bf16.mxu1 %v2865_v22 }
  0x6d   : > { %931 = vmatpush1.bf16.msra.mxu0 %v2954_v51 }
  0x6e   : > { %684 = vmatpush2.bf16.msra.mxu1 %v2869_v23  ;;  %932 = vmatprep.subr.bf16.mxu0 %v2957_v52 }
  0x6f   : > { %685 = vmatprep.subr.bf16.mxu1 %v2871_v24 }
  0x71   : > { %933 = vmatpush2.bf16.msra.mxu0 %v2960_v53 }
  0x72   : > { %686 = vmatpush2.bf16.msra.mxu1 %v2875_v25  ;;  %934 = vmatprep.subr.bf16.mxu0 %v2963_v54 }
  0x73   : > { %687 = vmatprep.subr.bf16.mxu1 %v2877_v26 }
  0x75   : > { %935 = vmatpush2.bf16.msra.mxu0 %v2966_v55 }
  0x76   : > { %688 = vmatpush2.bf16.msra.mxu1 %v2881_v27  ;;  %936 = vmatprep.subr.bf16.mxu0 %v2969_v56  ;;  %v388_v56 = vrot.slane %v383_v0, %v2988_v3 }
  0x77   : > { %689 = vmatprep.subr.bf16.mxu1 %v2883_v28 }
  0x79   : > { %937 = vmatpush2.bf16.msra.mxu0 %v2972_v57  ;;  %v2993_v57 = vsub.s32 1, %v386_v63  ;;  %v2999_v63 = vld [vmem:[#allocation5 + $0xa4] ss:$8 sps:$4 sm:$0xff]  }
  0x7a   : > { %690 = vmatpush2.bf16.msra.mxu1 %v2887_v29  ;;  %938 = vmatprep.subr.bf16.mxu0 %v2975_v58 }
  0x7b   : > { %691 = vmatprep.subr.bf16.mxu1 %v2892_v30  ;;  %v392_v55 = vrot.slane %v383_v0, %v2993_v57  ;;  %v3005_v0 = vld [vmem:[#allocation5 + $0x94] ss:$8 sps:$4 sm:$0xff]  }
  0x7d   : > { %939 = vmatpush2.bf16.msra.mxu0 %v2978_v59 }
  0x7e   : > { %692 = vmatpush2.bf16.msra.mxu1 %v2894_v31  ;;  %940 = vmatprep.subr.bf16.mxu0 %v2981_v60 }
  0x7f   : > { %693 = vmatprep.subr.bf16.mxu1 %v2898_v32 }
  0x81   : > { %941 = vmatpush2.bf16.msra.mxu0 %v2984_v61 }
  0x82   : > { %694 = vmatpush2.bf16.msra.mxu1 %v2900_v33  ;;  %942 = vmatprep.subr.bf16.mxu0 %v2999_v63 }
  0x83   : > { %695 = vmatprep.subr.bf16.mxu1 %v2904_v34 }
  0x85   : > { %943 = vmatpush2.bf16.msra.mxu0 %v3001_v46 }
  0x86   : > { %696 = vmatpush2.bf16.msra.mxu1 %v2906_v35  ;;  %944 = vmatprep.subr.bf16.mxu0 %v3005_v0 }
 0x109   : > { %v448_v58 = vpop.f32.mrf.mxu1 }
 0x10a   : > { %v449_v53 = vadd.f32 %v448_v58, %v388_v56  ;;  %v2461_v58 = vld [vmem:[#allocation7 + $0x60] sm:$0xff]  }
 0x10b   : > { %v450_v59 = vpop.f32.mrf.mxu1 }
 0x10c   : > { %v451_v52 = vadd.f32 %v450_v59, %v392_v55  ;;  %v2462_v59 = vld [vmem:[#allocation7 + $0x20] sm:$0xff]  }
 0x10d   : > { %v452_v54 = vpop.f32.mrf.mxu1 }
 0x10e   : > { %v453_v60 = vadd.f32 %v452_v54, %v388_v56  ;;  %v3007_v54 = vld [vmem:[#allocation5 + $0x90] ss:$8 sps:$4 sm:$0xff]   ;;  %v2460_v56 = vld [vmem:[#allocation7 + $0x28] sm:$0xff]  }
 0x10f   : > { %v454_v61 = vpop.f32.mrf.mxu1  ;;  %3246 = vst [vmem:[#allocation28_spill] sm:$0xff] %v3007_v54  ;;  %945 = vmatpush2.bf16.msra.mxu0 %v3007_v54 }
 0x110   : > { %v455_v62 = vadd.f32 %v454_v61, %v392_v55  ;;  %v457_v51 = vpack.c.bf16 %v453_v60, %v449_v53  ;;  %v2458_v53 = vld [vmem:[#allocation7 + $0x30] sm:$0xff]   ;;  %v2459_v55 = vld [vmem:[#allocation7 + $0x68] sm:$0xff]   ;;  %v2463_v60 = vld [vmem:[#allocation7 + $0x58] sm:$0xff]  }
 0x111   : > { %v2464_v61 = vld [vmem:[#allocation7 + $0x18] sm:$0xff]  }
 0x112   : > { %v458_v50 = vpack.c.bf16 %v455_v62, %v451_v52  ;;  %v459_v47 = vmax.bf16 %v3245_v49, %v457_v51  ;;  %v2456_v51 = vld [vmem:[#allocation7 + $0x38] sm:$0xff]   ;;  %v2457_v52 = vld [vmem:[#allocation7 + $0x70] sm:$0xff]  }
 0x114   : > { %v460_v48 = vmax.bf16 %v3245_v49, %v458_v50  ;;  %v3011_v50 = vld [vmem:[#allocation5 + $0x84] ss:$8 sps:$4 sm:$0xff]  }
 0x115   : > { %3247 = vst [vmem:[#allocation29_spill] sm:$0xff] %v3011_v50  ;;  %946 = vmatprep.subr.bf16.mxu0 %v3011_v50 }
 0x116   : > { %697 = vmatprep.mubr.bf16.mxu1 %v460_v48  ;;  %v3013_v48 = vld [vmem:[#allocation5 + $0x80] ss:$8 sps:$4 sm:$0xff]  }
 0x117   : > { %698 = vmatmul.mubr.bf16.vlgmr.msra.gmra.mxu1 %v459_v47  ;;  %3248 = vst [vmem:[#allocation30_spill] sm:$0xff] %v3013_v48  ;;  %947 = vmatpush2.bf16.msra.mxu0 %v3013_v48  ;;  %v2455_v47 = vld [vmem:[#allocation7 + $0x78] sm:$0xff]  }
 0x118   : > { %1197 = vmatprep.subr.bf16.mxu0 %v2803_v1  ;;  %2233 = vmatprep.subr.bf16.mxu1 %v2455_v47  ;;  %v493_v1 = vld [vmem:[%s3192_s4] sm:$0x3] }
 0x119   : > { %2234 = vmatpush3.bf16.msra.mxu1 %v2456_v51  ;;  %v498_v47 = vrot.slane %v493_v1, %v2988_v3 }
 0x11a   : > { %2235 = vmatprep.subr.bf16.mxu1 %v2457_v52  ;;  %v502_v52 = vrot.slane %v493_v1, %v2993_v57  ;;  %v2454_v1 = vld [vmem:[%s2798_s14 + $0x8] sm:$0xff]  }
 0x11d   : > { %2236 = vmatpush3.bf16.msra.mxu1 %v2458_v53 }
 0x11e   : > { %2237 = vmatprep.subr.bf16.mxu1 %v2459_v55 }
 0x121   : > { %2238 = vmatpush3.bf16.msra.mxu1 %v2460_v56 }
 0x122   : > { %2239 = vmatprep.subr.bf16.mxu1 %v2461_v58 }
 0x125   : > { %2240 = vmatpush3.bf16.msra.mxu1 %v2462_v59 }
 0x126   : > { %2241 = vmatprep.subr.bf16.mxu1 %v2463_v60 }
 0x129   : > { %2242 = vmatpush3.bf16.msra.mxu1 %v2464_v61 }
 0x1d7   : > { %v699_v62 = vpop.f32.mrf.mxu1 }
 0x1d8   : > { %v700_v56 = vadd.f32 %v699_v62, %v498_v47  ;;  %v3254_v62 = vld [vmem:[#allocation17_spill] sm:$0xff] }
 0x1d9   : > { %v701_v51 = vpop.f32.mrf.mxu1 }
 0x1da   : > { %v702_v59 = vadd.f32 %v701_v51, %v502_v52  ;;  %v3261_v51 = vld [vmem:[#allocation24_spill] sm:$0xff] }
 0x1db   : > { %v703_v53 = vpop.f32.mrf.mxu1 }
 0x1dc   : > { %v704_v55 = vadd.f32 %v703_v53, %v498_v47  ;;  %v3260_v47 = vld [vmem:[#allocation23_spill] sm:$0xff]  ;;  %v3263_v53 = vld [vmem:[#allocation26_spill] sm:$0xff] }
 0x1dd   : > { %v705_v58 = vpop.f32.mrf.mxu1 }
 0x1de   : > { %v706_v48 = vadd.f32 %v705_v58, %v502_v52  ;;  %v708_v50 = vpack.c.bf16 %v704_v55, %v700_v56  ;;  %v3262_v52 = vld [vmem:[#allocation25_spill] sm:$0xff]  ;;  %v3264_v55 = vld [vmem:[#allocation27_spill] sm:$0xff]  ;;  %v3265_v56 = vld [vmem:[#allocation28_spill] sm:$0xff] }
 0x1df   : > { %v3266_v58 = vld [vmem:[#allocation29_spill] sm:$0xff] }
 0x1e0   : > { %v709_v60 = vpack.c.bf16 %v706_v48, %v702_v59  ;;  %v710_v54 = vmax.bf16 %v3245_v49, %v708_v50  ;;  %v3252_v48 = vld [vmem:[#allocation15_spill] sm:$0xff]  ;;  %v3267_v59 = vld [vmem:[#allocation30_spill] sm:$0xff] }
 0x1e2   : > { %v711_v61 = vmax.bf16 %v3245_v49, %v709_v60  ;;  %v2471_v60 = vld [vmem:[#allocation7 + $0x78] sm:$0xff]  }
 0x1e4   : > { %948 = vmatprep.mubr.bf16.mxu0 %v711_v61  ;;  %v2472_v61 = vld [vmem:[#allocation7 + $0x38] sm:$0xff]  }
 0x1e5   : > { %949 = vmatmul.mubr.bf16.vlgmr.msra.gmra.mxu0 %v710_v54 }
 0x1e6   : > { %1198 = vmatpush1.bf16.msra.mxu0 %v2808_v2  ;;  %1215 = vmatprep.mubr.bf16.mxu0 %v3245_v49  ;;  %v2465_v2 = vld [vmem:[#allocation7 + $0x50] sm:$0xff]  }
 0x1e7   : > { %1434 = vmatprep.subr.bf16.mxu0 %v2815_v5  ;;  %2243 = vmatprep.subr.bf16.mxu1 %v2465_v2  ;;  %v2467_v5 = vld [vmem:[#allocation7 + $0x48] sm:$0xff]   ;;  %v2474_v2 = vld [vmem:[#allocation7 + $0x30] sm:$0xff]  }
 0x1ed   : > { %2128 = vmatmul.mubr.msk.bf16.vlgmr.msra.gmra.mxu0 %vm410_vm0, %v2454_v1  ;;  %v2473_v1 = vld [vmem:[#allocation7 + $0x70] sm:$0xff]  }
 0x1ee   : > { %1435 = vmatpush1.bf16.msra.mxu0 %v2813_v4  ;;  %v2466_v4 = vld [vmem:[#allocation7 + $0x10] sm:$0xff]  }
 0x1ef   : > { %1436 = vmatprep.subr.bf16.mxu0 %v2817_v6  ;;  %2244 = vmatpush3.bf16.msra.mxu1 %v2466_v4  ;;  %v2468_v6 = vld [vmem:[#allocation7 + $0x8] sm:$0xff]  }
 0x1f0   : > { %2245 = vmatprep.subr.bf16.mxu1 %v2467_v5  ;;  %v2475_v4 = vld [vmem:[#allocation7 + $0x68] sm:$0xff]   ;;  %v2479_v5 = vld [vmem:[#allocation7 + $0x58] sm:$0xff]  }
 0x1f2   : > { %1437 = vmatpush1.bf16.msra.mxu0 %v2822_v7  ;;  %v2469_v7 = vld [vmem:[#allocation7 + $0x40] sm:$0xff]  }
 0x1f3   : > { %1438 = vmatprep.subr.bf16.mxu0 %v2825_v8  ;;  %2246 = vmatpush3.bf16.msra.mxu1 %v2468_v6  ;;  %v2470_v8 = vld [vmem:[#allocation7] sm:$0xff]   ;;  %v2480_v6 = vld [vmem:[#allocation7 + $0x18] sm:$0xff]  }
 0x1f4   : > { %2247 = vmatprep.subr.bf16.mxu1 %v2469_v7 }
 0x1f6   : > { %1439 = vmatpush1.bf16.msra.mxu0 %v2828_v9  ;;  %v744_v9 = vld [vmem:[%s3194_s6] sm:$0x3] }
 0x1f7   : > { %1440 = vmatprep.subr.bf16.mxu0 %v2831_v10  ;;  %2248 = vmatpush3.bf16.msra.mxu1 %v2470_v8 }
 0x1f8   : > { %1685 = vmatprep.subr.bf16.mxu1 %v2910_v36 }
 0x1fa   : > { %1441 = vmatpush1.bf16.msra.mxu0 %v2834_v11  ;;  %v749_v11 = vrot.slane %v744_v9, %v2988_v3 }
 0x1fb   : > { %1442 = vmatprep.subr.bf16.mxu0 %v2837_v12 }
 0x1fe   : > { %1443 = vmatpush1.bf16.msra.mxu0 %v2840_v13  ;;  %v753_v13 = vrot.slane %v744_v9, %v2993_v57 }
 0x1ff   : > { %1444 = vmatprep.subr.bf16.mxu0 %v2842_v14 }
 0x202   : > { %1445 = vmatpush1.bf16.msra.mxu0 %v2845_v15 }
 0x203   : > { %1446 = vmatprep.subr.bf16.mxu0 %v2847_v16 }
 0x206   : > { %1447 = vmatpush1.bf16.msra.mxu0 %v2851_v17 }
 0x207   : > { %1448 = vmatprep.subr.bf16.mxu0 %v2853_v18 }
 0x20a   : > { %1449 = vmatpush1.bf16.msra.mxu0 %v2857_v19 }
 0x20b   : > { %1450 = vmatprep.subr.bf16.mxu0 %v2859_v20  ;;  %v1153_v20 = vld [vmem:[%s3190_s2] sm:$0x3] }
 0x20e   : > { %1451 = vmatpush2.bf16.msra.mxu0 %v2863_v21 }
 0x20f   : > { %1452 = vmatprep.subr.bf16.mxu0 %v2865_v22 }
 0x212   : > { %1453 = vmatpush2.bf16.msra.mxu0 %v2869_v23 }
 0x213   : > { %1454 = vmatprep.subr.bf16.mxu0 %v2871_v24  ;;  %v1158_v24 = vrot.slane %v1153_v20, %v2988_v3 }
 0x216   : > { %1455 = vmatpush2.bf16.msra.mxu0 %v2875_v25 }
 0x217   : > { %1456 = vmatprep.subr.bf16.mxu0 %v2877_v26  ;;  %v1162_v26 = vrot.slane %v1153_v20, %v2993_v57 }
 0x21a   : > { %1457 = vmatpush2.bf16.msra.mxu0 %v2881_v27 }
 0x21b   : > { %1458 = vmatprep.subr.bf16.mxu0 %v2883_v28 }
 0x21e   : > { %1459 = vmatpush2.bf16.msra.mxu0 %v2887_v29 }
 0x21f   : > { %1460 = vmatprep.subr.bf16.mxu0 %v2892_v30 }
 0x222   : > { %1461 = vmatpush2.bf16.msra.mxu0 %v2894_v31 }
 0x223   : > { %1462 = vmatprep.subr.bf16.mxu0 %v2898_v32 }
 0x226   : > { %1463 = vmatpush2.bf16.msra.mxu0 %v2900_v33 }
 0x227   : > { %1464 = vmatprep.subr.bf16.mxu0 %v2904_v34 }
 0x22a   : > { %1465 = vmatpush2.bf16.msra.mxu0 %v2906_v35 }
 0x22b   : > { %2255 = vmatprep.subr.bf16.mxu0 %v2471_v60 }
 0x2a5   : > { %v950_v10 = vpop.f32.mrf.mxu0 }
 0x2a6   : > { %v951_v16 = vadd.f32 %v950_v10, %v749_v11 }
 0x2a7   : > { %v952_v12 = vpop.f32.mrf.mxu0 }
 0x2a8   : > { %v953_v18 = vadd.f32 %v952_v12, %v753_v13 }
 0x2a9   : > { %v954_v14 = vpop.f32.mrf.mxu0 }
 0x2aa   : > { %v955_v15 = vadd.f32 %v954_v14, %v749_v11  ;;  %v3111_v11 = vld [vmem:[%s3196_s8] ss:$0 sm:$0xff] }
 0x2ab   : > { %v956_v17 = vpop.f32.mrf.mxu0  ;;  %v1262_v14 = vld [vmem:[%s3192_s4] sm:$0x3] }
 0x2ac   : > { %v957_v19 = vadd.f32 %v956_v17, %v753_v13  ;;  %v959_v21 = vpack.c.bf16 %v955_v15, %v951_v16 }
 0x2ad   : > { %v1217_v22 = vpop.f32.mrf.mxu0 }
 0x2ae   : > { %v960_v23 = vpack.c.bf16 %v957_v19, %v953_v18  ;;  %v961_v28 = vmax.bf16 %v3245_v49, %v959_v21  ;;  %v1218_v31 = vadd.f32 %v1217_v22, %v1158_v24  ;;  %v1267_v18 = vrot.slane %v1262_v14, %v2988_v3 }
 0x2af   : > { %v1219_v25 = vpop.f32.mrf.mxu0  ;;  %v1271_v21 = vrot.slane %v1262_v14, %v2993_v57 }
 0x2b0   : > { %v962_v27 = vmax.bf16 %v3245_v49, %v960_v23  ;;  %v1220_v33 = vadd.f32 %v1219_v25, %v1162_v26 }
 0x2b1   : > { %v1221_v29 = vpop.f32.mrf.mxu0 }
 0x2b2   : > { %v1222_v30 = vadd.f32 %v1221_v29, %v1158_v24  ;;  %1130 = vmatprep.mubr.bf16.mxu1 %v962_v27 }
 0x2b3   : > { %1131 = vmatmul.mubr.bf16.vlgmr.msra.gmra.mxu1 %v961_v28  ;;  %v1223_v32 = vpop.f32.mrf.mxu0 }
 0x2b4   : > { %v1224_v34 = vadd.f32 %v1223_v32, %v1162_v26  ;;  %1686 = vmatpush1.bf16.msra.mxu1 %v2912_v37  ;;  %v1226_v35 = vpack.c.bf16 %v1222_v30, %v1218_v31  ;;  %v3249_v37 = vld [vmem:[#allocation12_spill] sm:$0xff]  ;;  %v2481_v32 = vld [vmem:[#allocation7 + $0x50] sm:$0xff]  }
 0x2b5   : > { %1687 = vmatprep.subr.bf16.mxu1 %v2914_v38  ;;  %v3250_v38 = vld [vmem:[#allocation13_spill] sm:$0xff] }
 0x2b6   : > { %v1227_v36 = vpack.c.bf16 %v1224_v34, %v1220_v33  ;;  %v1228_v50 = vmax.bf16 %v3245_v49, %v1226_v35  ;;  %v2482_v33 = vld [vmem:[#allocation7 + $0x10] sm:$0xff]   ;;  %v2483_v34 = vld [vmem:[#allocation7 + $0x48] sm:$0xff]  }
 0x2b7   : > { %v2484_v35 = vld [vmem:[#allocation7 + $0x8] sm:$0xff]  }
 0x2b8   : > { %v1229_v54 = vmax.bf16 %v3245_v49, %v1227_v36  ;;  %1688 = vmatpush1.bf16.msra.mxu1 %v2918_v39  ;;  %v3251_v39 = vld [vmem:[#allocation14_spill] sm:$0xff]  ;;  %v2485_v36 = vld [vmem:[#allocation7 + $0x40] sm:$0xff]  }
 0x2b9   : > { %1689 = vmatprep.subr.bf16.mxu1 %v2921_v40  ;;  %v3253_v40 = vld [vmem:[#allocation16_spill] sm:$0xff] }
 0x2ba   : > { %1466 = vmatprep.mubr.bf16.mxu0 %v1229_v54  ;;  %v2486_v54 = vld [vmem:[#allocation7] sm:$0xff]  }
 0x2bb   : > { %1467 = vmatmul.mubr.bf16.vlgmr.msra.gmra.mxu0 %v1228_v50  ;;  %v1513_v50 = vld [vmem:[%s3194_s6] sm:$0x3] }
 0x2bc   : > { %1690 = vmatpush1.bf16.msra.mxu1 %v2924_v41  ;;  %v3255_v41 = vld [vmem:[#allocation18_spill] sm:$0xff]  ;;  %2256 = vmatpush3.bf16.msra.mxu0 %v2472_v61 }
 0x2bd   : > { %1691 = vmatprep.subr.bf16.mxu1 %v2927_v42  ;;  %v3256_v42 = vld [vmem:[#allocation19_spill] sm:$0xff]  ;;  %2257 = vmatprep.subr.bf16.mxu0 %v2473_v1 }
 0x2c0   : > { %1692 = vmatpush1.bf16.msra.mxu1 %v2930_v43  ;;  %v3257_v43 = vld [vmem:[#allocation20_spill] sm:$0xff]  ;;  %2258 = vmatpush3.bf16.msra.mxu0 %v2474_v2 }
 0x2c1   : > { %1693 = vmatprep.subr.bf16.mxu1 %v2933_v44  ;;  %v3258_v44 = vld [vmem:[#allocation21_spill] sm:$0xff]  ;;  %2259 = vmatprep.subr.bf16.mxu0 %v2475_v4 }
 0x2c4   : > { %1694 = vmatpush1.bf16.msra.mxu1 %v2936_v45  ;;  %v3259_v45 = vld [vmem:[#allocation22_spill] sm:$0xff] }
 0x2c5   : > { %1695 = vmatprep.subr.bf16.mxu1 %v3249_v37 }
 0x2c8   : > { %1696 = vmatpush1.bf16.msra.mxu1 %v3250_v38  ;;  %v1518_v38 = vrot.slane %v1513_v50, %v2988_v3 }
 0x2c9   : > { %1697 = vmatprep.subr.bf16.mxu1 %v3251_v39 }
 0x2cc   : > { %1698 = vmatpush1.bf16.msra.mxu1 %v3252_v48  ;;  %v1522_v48 = vrot.slane %v1513_v50, %v2993_v57 }
 0x2cd   : > { %1699 = vmatprep.subr.bf16.mxu1 %v3253_v40 }
 0x2d0   : > { %1700 = vmatpush1.bf16.msra.mxu1 %v3254_v62 }
 0x2d1   : > { %1701 = vmatprep.subr.bf16.mxu1 %v3255_v41 }
 0x2d4   : > { %1702 = vmatpush2.bf16.msra.mxu1 %v3256_v42 }
 0x2d5   : > { %1703 = vmatprep.subr.bf16.mxu1 %v3257_v43 }
 0x2d8   : > { %1704 = vmatpush2.bf16.msra.mxu1 %v3258_v44 }
 0x2d9   : > { %1705 = vmatprep.subr.bf16.mxu1 %v3259_v45 }
 0x2dc   : > { %1706 = vmatpush2.bf16.msra.mxu1 %v3260_v47 }
 0x2dd   : > { %1707 = vmatprep.subr.bf16.mxu1 %v3261_v51 }
 0x2e0   : > { %1708 = vmatpush2.bf16.msra.mxu1 %v3262_v52 }
 0x2e1   : > { %1709 = vmatprep.subr.bf16.mxu1 %v3263_v53 }
 0x2e4   : > { %1710 = vmatpush2.bf16.msra.mxu1 %v3264_v55 }
 0x2e5   : > { %1711 = vmatprep.subr.bf16.mxu1 %v2999_v63  ;;  %v2476_v63 = vld [vmem:[#allocation7 + $0x28] sm:$0xff]  }
 0x2e6   : > { %2260 = vmatpush3.bf16.msra.mxu0 %v2476_v63 }
 0x2e8   : > { %1712 = vmatpush2.bf16.msra.mxu1 %v3001_v46  ;;  %v2477_v46 = vld [vmem:[#allocation7 + $0x60] sm:$0xff]  }
 0x2e9   : > { %1713 = vmatprep.subr.bf16.mxu1 %v3005_v0  ;;  %v2478_v0 = vld [vmem:[#allocation7 + $0x20] sm:$0xff]   ;;  %2261 = vmatprep.subr.bf16.mxu0 %v2477_v46 }
 0x2ea   : > { %2262 = vmatpush3.bf16.msra.mxu0 %v2478_v0 }
 0x2eb   : > { %2263 = vmatprep.subr.bf16.mxu0 %v2479_v5 }
 0x2ec   : > { %1714 = vmatpush2.bf16.msra.mxu1 %v3265_v56 }
 0x2ed   : > { %1715 = vmatprep.subr.bf16.mxu1 %v3266_v58 }
 0x2ee   : > { %2264 = vmatpush3.bf16.msra.mxu0 %v2480_v6 }
 0x2ef   : > { %2265 = vmatprep.subr.bf16.mxu0 %v2481_v32 }
 0x2f0   : > { %1716 = vmatpush2.bf16.msra.mxu1 %v3267_v59 }
 0x2f2   : > { %2266 = vmatpush3.bf16.msra.mxu0 %v2482_v33 }
 0x2f3   : > { %2267 = vmatprep.subr.bf16.mxu0 %v2483_v34 }
 0x2f6   : > { %2268 = vmatpush3.bf16.msra.mxu0 %v2484_v35 }
 0x2f7   : > { %2269 = vmatprep.subr.bf16.mxu0 %v2485_v36 }
 0x2fa   : > { %2270 = vmatpush3.bf16.msra.mxu0 %v2486_v54 }
 0x373   : > { %v2249_v7 = vpop.f32.mrf.mxu1 }
 0x375   : > { %v2250_v8 = vpop.f32.mrf.mxu1 }
 0x376   : > { %v2251_v10 = vadd.f32 %v2250_v8, %v2249_v7 }
 0x377   : > { %v2252_v9 = vpop.f32.mrf.mxu1 }
 0x378   : > { %v1133_v16 = vadd.f32 %v2251_v10, %v3111_v11 }
 0x379   : > { %v2253_v12 = vpop.f32.mrf.mxu1 }
 0x37a   : > { %v2254_v13 = vadd.f32 %v2253_v12, %v2252_v9 }
 0x37b   : > { %v1468_v15 = vpop.f32.mrf.mxu0 }
 0x37c   : > { %v1136_v17 = vadd.f32 %v2254_v13, %v3111_v11  ;;  %v1469_v24 = vadd.f32 %v1468_v15, %v1267_v18 }
 0x37d   : > { %v1470_v19 = vpop.f32.mrf.mxu0 }
 0x37e   : > { %v2225_v20 = vpack.c.bf16 %v1136_v17, %v1133_v16  ;;  %v1471_v26 = vadd.f32 %v1470_v19, %v1271_v21 }
 0x37f   : > { %v1472_v22 = vpop.f32.mrf.mxu0 }
 0x380   : > { %2226 = vst [vmem:[%s3122_s27] sm:$0xff] %v2225_v20   ;;  %v1473_v23 = vadd.f32 %v1472_v22, %v1267_v18 }
 0x381   : > { %v1474_v25 = vpop.f32.mrf.mxu0 }
 0x382   : > { %v1475_v27 = vadd.f32 %v1474_v25, %v1271_v21  ;;  %v1477_v28 = vpack.c.bf16 %v1473_v23, %v1469_v24 }
 0x384   : > { %v1478_v29 = vpack.c.bf16 %v1475_v27, %v1471_v26  ;;  %v1479_v31 = vmax.bf16 %v3245_v49, %v1477_v28 }
 0x386   : > { %v1480_v30 = vmax.bf16 %v3245_v49, %v1478_v29 }
 0x388   : > { %1717 = vmatprep.mubr.bf16.mxu1 %v1480_v30 }
 0x389   : > { %1718 = vmatmul.mubr.bf16.vlgmr.msra.gmra.mxu1 %v1479_v31 }
 0x449   : > { %v1719_v37 = vpop.f32.mrf.mxu1 }
 0x44a   : > { %v1720_v41 = vadd.f32 %v1719_v37, %v1518_v38 }
 0x44b   : > { %v1721_v39 = vpop.f32.mrf.mxu1 }
 0x44c   : > { %v1722_v43 = vadd.f32 %v1721_v39, %v1522_v48 }
 0x44d   : > { %v1723_v40 = vpop.f32.mrf.mxu1 }
 0x44e   : > { %v1724_v62 = vadd.f32 %v1723_v40, %v1518_v38 }
 0x44f   : > { %v1725_v42 = vpop.f32.mrf.mxu1 }
 0x450   : > { %v1726_v44 = vadd.f32 %v1725_v42, %v1522_v48  ;;  %v1728_v45 = vpack.c.bf16 %v1724_v62, %v1720_v41 }
 0x452   : > { %v1729_v47 = vpack.c.bf16 %v1726_v44, %v1722_v43  ;;  %v1730_v52 = vmax.bf16 %v3245_v49, %v1728_v45 }
 0x454   : > { %v1731_v51 = vmax.bf16 %v3245_v49, %v1729_v47 }
 0x456   : > { %1899 = vmatprep.mubr.bf16.mxu0 %v1731_v51 }
 0x457   : > { %1900 = vmatmul.mubr.bf16.vlgmr.msra.gmra.mxu0 %v1730_v52 }
 0x517   : > { %v2271_v3 = vpop.f32.mrf.mxu0 }
 0x519   : > { %v2272_v57 = vpop.f32.mrf.mxu0 }
 0x51a   : > { %v2273_v55 = vadd.f32 %v2272_v57, %v2271_v3 }
 0x51b   : > { %v2274_v53 = vpop.f32.mrf.mxu0 }
 0x51c   : > { %v1902_v59 = vadd.f32 %v2273_v55, %v3111_v11 }
 0x51d   : > { %v2275_v56 = vpop.f32.mrf.mxu0 }
 0x51e   : > { %v2276_v58 = vadd.f32 %v2275_v56, %v2274_v53 }
 0x520   : > { %v1905_v60 = vadd.f32 %v2276_v58, %v3111_v11 }
 0x522   : > { %v2230_v49 = vpack.c.bf16 %v1905_v60, %v1902_v59 }
 0x524   : > { %2232 = vst [vmem:[%s3122_s27 + $0x8] sm:$0xff] %v2230_v49  }
 0x525   : > { %2578 = shalt.err (!%p2575_p0)
}
 0x526   : > { %s2579_s16 = scalar_lea.hbm %s3143_s23, 256  ;;  %s2583_s28 = scalar_lea.hbm %s3197_s9, 512 }
 0x527   : > { %p2580_p6 = scmp.ne.s32.totalorder %s3143_s23, %s2579_s16  ;;  %p2584_p5 = scmp.lt.s32.totalorder %s3143_s23, %s3197_s9 }
 0x528   : > { %p2585_p1 = scmp.lt.s32.totalorder %s2583_s28, %s2579_s16 }
 0x529   : > { %p2581_p9 = pnand %p2580_p6, %p3268_p3 }
 0x52a   : > { %p2586_p12 = por %p2585_p1, %p2584_p5 }
 0x52b   : > { %p2582_p13 = pneg %p2581_p9 }
 0x52d   : > { %p2587_p10 = pnand %p2586_p12, %p2582_p13 }
 0x52f   : > { %2590 = shalt.err (!%p2587_p10)
}
 0x530   : > { %s2644_s13 = smov 64   ;;  %s2645_s22 = smov 4  }
 0x531   : > { %2289 = dma.vmem_to_hbm [thread:$0]  (%p3268_p3), %s3138_s26, 256, %s3143_s23, %s3148_s17, %s2644_s13, %s2644_s13, %s2645_s22  }
 0x532 PF: > { %p2311_p2 = scmp.ge.s32.totalorder %s2633_s12, 2  ;;  %s1947_s25 = sand.u32 1, %s2621_s30  }
 0x533   : > { %p3269_p4 = scmp.ne.s32.totalorder %s3222_s20, 0  ;;  %s1948_s24 = scalar_lea.sflag [#allocation4], %s1947_s25 }
 0x535   : > { %p2302_p7 = pnand %p2311_p2, %p3269_p4 }
 0x537   : > { %p2303_p8 = pneg %p2302_p7 }
 0x539   : > { %2616 = dma.done.wait (%p2303_p8), %s1948_s24, 256  }
 0x53a   : > { %2618 = vsyncadd (%p2303_p8), %s1948_s24, 4294967040  ;;  %p21_p11 = scmp.ge.s32.totalorder %s2721_s15, 4   ;;  %s3270_s30 = smov %s2625_s10 }
 0x53b   : > { %s3271_s10 = smov %s2629_s11  ;;  %s3272_s11 = smov %s2732_s18 }
 0x53c   : > { %s3273_s12 = smov %s2721_s15  ;;  %23 = sbr.rel (!%p21_p11) target bundleno = 5 (0x5), region = 104 }
 0x541   :  { %1953 = vsyncpa [#allocation3], 1 }
 0x542   :  { %1955 = vsyncpa [#allocation3 + $0x1], 1 }
 0x543   :  { %1956 = vsyncpa [#allocation6], 1 }
 0x544   :  { %1957 = vsyncpa [#allocation4], 1 }
 0x545   :  { %1959 = vsyncpa [#allocation4 + $0x1], 1 }

</bundles_post_ra>
